<compile_context>
chip_gen: v6e
topology: v6e:2x2x1
jax: 0.10.0
libtpu: 0.0.40
codegen_flags: <defaults>
</compile_context>

<pallas_src>
import functools

import jax
import jax.numpy as jnp
from jax.experimental import pallas as pl
from jax.experimental.pallas import tpu as pltpu


def _mlp_kernel(x_ref,
                w0_ref, b0_ref,
                w1_ref, b1_ref,
                w2_ref, b2_ref,
                w3_ref, b3_ref,
                w4_ref, b4_ref,
                w5_ref, b5_ref,
                o_ref,
                *, bf16_matmul):
    """Full ModelE forward for one batch tile; all operands live in VMEM."""

    def dense(h, w_ref, b_ref):
        # MXU matmul (bf16 or f32 operands), always f32 accumulation.
        return (jnp.dot(h, w_ref[...], preferred_element_type=jnp.float32)
                + b_ref[...])

    x = x_ref[...]
    if bf16_matmul:
        # In-kernel cast: cheap VPU work hidden under the x DMA; avoids a
        # separate wrapper-side convert pass over x in HBM.  Explicit cast so
        # the layer-0 matmul genuinely runs in bf16 (w0 is already bf16).
        x = x.astype(jnp.bfloat16)

    h = jax.nn.relu(dense(x, w0_ref, b0_ref))   # (tb, 128)
    h = jax.nn.relu(dense(h, w1_ref, b1_ref))   # (tb, 64)
    h = jax.nn.relu(dense(h, w2_ref, b2_ref))   # (tb, 10)
    h = jax.nn.relu(dense(h, w3_ref, b3_ref))   # (tb, 10)
    h = jax.nn.relu(dense(h, w4_ref, b4_ref))   # (tb, 10)
    logits = dense(h, w5_ref, b5_ref)           # (tb, 10)

    # Numerically stable log_softmax along the class axis.
    m = jnp.max(logits, axis=-1, keepdims=True)
    shifted = logits - m
    lse = jnp.log(jnp.sum(jnp.exp(shifted), axis=-1, keepdims=True))
    o_ref[...] = (shifted - lse).astype(o_ref.dtype)


def model_e_forward(x, params, *, tile_b=2048, bf16_matmul=True):
    """x: (B, C, H, W) float32.  Returns (B, 10) log-probabilities.

    tile_b:      max rows per grid step (rounded to a multiple of 8).  2048
                 amortizes per-step overhead while the f32 x double-buffer
                 (16 MB) + in-kernel bf16 copy still fits v7x's 64 MiB VMEM.
    bf16_matmul: layer-0 matmul in bf16 (x cast in-kernel, w0 cast once in the
                 wrapper), f32 accumulation.  All other math stays f32.
    """
    B = x.shape[0]
    image_size = int(x.size // B)
    # x streams into the kernel as f32 — no standalone bf16 conversion pass.
    x2d = x.reshape(B, image_size).astype(jnp.float32)

    # --- batch tiling: no jnp.pad; partial tail block is masked by Pallas ---
    b_up8 = -(-B // 8) * 8
    tb = max(8, min((int(tile_b) // 8) * 8, b_up8))
    grid = (pl.cdiv(B, tb),)

    # --- operand prep -------------------------------------------------------
    flat_args = []
    in_specs = [pl.BlockSpec((tb, image_size), lambda i: (i, 0))]
    for li, (w, b) in enumerate(params):
        # Only layer 0 carries meaningful FLOPs/bytes -> bf16 it if requested.
        w_dtype = jnp.bfloat16 if (bf16_matmul and li == 0) else jnp.float32
        w_arr = w.astype(w_dtype)
        b_arr = b.reshape(1, -1).astype(jnp.float32)   # explicit (1, N) layout
        flat_args += [w_arr, b_arr]
        # Constant index_maps -> weights stay resident in VMEM across the grid.
        in_specs.append(pl.BlockSpec(w_arr.shape, lambda i: (0, 0)))
        in_specs.append(pl.BlockSpec(b_arr.shape, lambda i: (0, 0)))
    # TODO(synk): if a profile still shows exposed x DMA, add
    # pipeline_mode=pl.Buffered(3) on the x BlockSpec only.

    # --- VMEM budget: 2x f32 x tile (double buffer) + bf16 copy + slack -----
    # Explicit because v5e's default scoped VMEM limit is only 16 MiB.
    x_tile_bytes = tb * image_size * 4
    vmem_limit = int(min(2.5 * x_tile_bytes + (16 << 20), 120 << 20))

    # --- advisory cost estimate ---------------------------------------------
    dims = [image_size] + [w.shape[1] for w, _ in params]
    flops = 2 * B * sum(dims[i] * dims[i + 1] for i in range(len(params)))
    transcendentals = B * (10 + 1)  # exp per class + log per row
    bytes_accessed = int(
        x2d.size * 4
        + sum(a.size * a.dtype.itemsize for a in flat_args)
        + B * 10 * 4)

    kernel = functools.partial(_mlp_kernel, bf16_matmul=bf16_matmul)

    out = pl.pallas_call(
        kernel,
        out_shape=jax.ShapeDtypeStruct((B, 10), jnp.float32),
        grid=grid,
        in_specs=in_specs,
        out_specs=pl.BlockSpec((tb, 10), lambda i: (i, 0)),
        compiler_params=pltpu.CompilerParams(
            dimension_semantics=("parallel",),
            vmem_limit_bytes=vmem_limit),
        cost_estimate=pl.CostEstimate(
            flops=flops,
            transcendentals=transcendentals,
            bytes_accessed=bytes_accessed),
    )(x2d, *flat_args)

    return out


def init_params(key, image_size):
    """Deterministic init matching PyTorch nn.Linear default (uniform +-1/sqrt(fan_in)).
    Weights stored as (in_features, out_features)."""
    dims = [image_size, 128, 64, 10, 10, 10, 10]
    params = []
    for i in range(6):
        fan_in, fan_out = dims[i], dims[i + 1]
        key, kw, kb = jax.random.split(key, 3)
        bound = 1.0 / (fan_in ** 0.5)
        w = jax.random.uniform(kw, (fan_in, fan_out), jnp.float32, -bound, bound)
        b = jax.random.uniform(kb, (fan_out,), jnp.float32, -bound, bound)
        params.append((w, b))
    return params


def reference_forward(x, params):
    """Pure-JAX f32 reference for sanity checking."""
    B = x.shape[0]
    h = x.reshape(B, -1)
    for i, (w, b) in enumerate(params):
        h = h @ w + b
        if i < 5:
            h = jax.nn.relu(h)
    return jax.nn.log_softmax(h, axis=1)


if __name__ == "__main__":
    key = jax.random.PRNGKey(0)
    k_x, k_p, k_x2 = jax.random.split(key, 3)

    # NCHW input; image_size = C*H*W = 4*16*16 = 1024
    B, C, H, W = 2, 4, 16, 16
    image_size = C * H * W
    x = jax.random.normal(k_x, (B, C, H, W), jnp.float32)

    params = init_params(k_p, image_size)
    ref = reference_forward(x, params)

    # 1) f32 mode: matches the pure-JAX reference tightly.
    out_f32 = jax.block_until_ready(model_e_forward(x, params, bf16_matmul=False))
    assert out_f32.shape == (B, 10)
    assert jnp.allclose(out_f32, ref, atol=1e-5, rtol=1e-5), "f32 mismatch vs reference"

    # 2) bf16 layer-0 mode (production path): looser tolerance for bf16 inputs.
    out_bf16 = jax.block_until_ready(model_e_forward(x, params, bf16_matmul=True))
    assert out_bf16.shape == (B, 10)
    assert jnp.allclose(out_bf16, ref, atol=5e-2, rtol=1e-2), "bf16 mismatch vs reference"

    # 3) Multi-step grid with a partial (masked) tail tile — the no-padding path.
    B2 = 20
    x2 = jax.random.normal(k_x2, (B2, C, H, W), jnp.float32)
    ref2 = reference_forward(x2, params)
    out2 = jax.block_until_ready(
        model_e_forward(x2, params, tile_b=8, bf16_matmul=False))
    assert out2.shape == (B2, 10)
    assert jnp.allclose(out2, ref2, atol=1e-5, rtol=1e-5), "partial-tile mismatch"

    print("KERNEL_OK")
</pallas_src>

<mosaic_0001>
module attributes {stable_mosaic.version = 11 : i64} {
  func.func @_mlp_kernel(%arg0: i32, %arg1: memref<8x1024xf32, #tpu.memory_space<vmem>>, %arg2: memref<1024x128xf32, #tpu.memory_space<vmem>>, %arg3: memref<1x128xf32, #tpu.memory_space<vmem>>, %arg4: memref<128x64xf32, #tpu.memory_space<vmem>>, %arg5: memref<1x64xf32, #tpu.memory_space<vmem>>, %arg6: memref<64x10xf32, #tpu.memory_space<vmem>>, %arg7: memref<1x10xf32, #tpu.memory_space<vmem>>, %arg8: memref<10x10xf32, #tpu.memory_space<vmem>>, %arg9: memref<1x10xf32, #tpu.memory_space<vmem>>, %arg10: memref<10x10xf32, #tpu.memory_space<vmem>>, %arg11: memref<1x10xf32, #tpu.memory_space<vmem>>, %arg12: memref<10x10xf32, #tpu.memory_space<vmem>>, %arg13: memref<1x10xf32, #tpu.memory_space<vmem>>, %arg14: memref<8x10xf32, #tpu.memory_space<vmem>>) attributes {dimension_semantics = [#tpu.dimension_semantics<parallel>], iteration_bounds = array<i64: 1>, scalar_prefetch = 0 : i64, scratch_operands = 0 : i64, tpu.core_type = #tpu.core_type<tc>, window_params = [{transform_indices = @transform_0, window_bounds = array<i64: 8, 1024>}, {pipeline_mode = #tpu.pipeline_mode<synchronous>, transform_indices = @transform_1, window_bounds = array<i64: 1024, 128>}, {pipeline_mode = #tpu.pipeline_mode<synchronous>, transform_indices = @transform_2, window_bounds = array<i64: 1, 128>}, {pipeline_mode = #tpu.pipeline_mode<synchronous>, transform_indices = @transform_3, window_bounds = array<i64: 128, 64>}, {pipeline_mode = #tpu.pipeline_mode<synchronous>, transform_indices = @transform_4, window_bounds = array<i64: 1, 64>}, {pipeline_mode = #tpu.pipeline_mode<synchronous>, transform_indices = @transform_5, window_bounds = array<i64: 64, 10>}, {pipeline_mode = #tpu.pipeline_mode<synchronous>, transform_indices = @transform_6, window_bounds = array<i64: 1, 10>}, {pipeline_mode = #tpu.pipeline_mode<synchronous>, transform_indices = @transform_7, window_bounds = array<i64: 10, 10>}, {pipeline_mode = #tpu.pipeline_mode<synchronous>, transform_indices = @transform_8, window_bounds = array<i64: 1, 10>}, {pipeline_mode = #tpu.pipeline_mode<synchronous>, transform_indices = @transform_9, window_bounds = array<i64: 10, 10>}, {pipeline_mode = #tpu.pipeline_mode<synchronous>, transform_indices = @transform_10, window_bounds = array<i64: 1, 10>}, {pipeline_mode = #tpu.pipeline_mode<synchronous>, transform_indices = @transform_11, window_bounds = array<i64: 10, 10>}, {pipeline_mode = #tpu.pipeline_mode<synchronous>, transform_indices = @transform_12, window_bounds = array<i64: 1, 10>}, {transform_indices = @transform_13, window_bounds = array<i64: 8, 10>}]} {
    %c0 = arith.constant 0 : index
    %c0_0 = arith.constant 0 : index
    %0 = vector.load %arg1[%c0, %c0_0] : memref<8x1024xf32, #tpu.memory_space<vmem>>, vector<8x1024xf32>
    %c0_1 = arith.constant 0 : index
    %c0_2 = arith.constant 0 : index
    %1 = vector.load %arg2[%c0_1, %c0_2] : memref<1024x128xf32, #tpu.memory_space<vmem>>, vector<1024x128xf32>
    %cst = arith.constant dense<0.000000e+00> : vector<8x128xf32>
    %2 = tpu.matmul %0, %1, %cst {dimension_numbers = #tpu.dot_dimension_numbers<[1], [0], [0], [1], [0, 0, 1, 1], [], []>} : vector<8x1024xf32>, vector<1024x128xf32>, vector<8x128xf32> -> vector<8x128xf32>
    %c0_3 = arith.constant 0 : index
    %c0_4 = arith.constant 0 : index
    %3 = vector.load %arg3[%c0_3, %c0_4] : memref<1x128xf32, #tpu.memory_space<vmem>>, vector<1x128xf32>
    %4 = vector.broadcast %3 : vector<1x128xf32> to vector<8x128xf32>
    %5 = arith.addf %2, %4 : vector<8x128xf32>
    %cst_5 = arith.constant 0.000000e+00 : f32
    %6 = vector.broadcast %cst_5 : f32 to vector<8x128xf32>
    %7 = arith.maximumf %5, %6 : vector<8x128xf32>
    %c0_6 = arith.constant 0 : index
    %c0_7 = arith.constant 0 : index
    %8 = vector.load %arg4[%c0_6, %c0_7] : memref<128x64xf32, #tpu.memory_space<vmem>>, vector<128x64xf32>
    %cst_8 = arith.constant dense<0.000000e+00> : vector<8x64xf32>
    %9 = tpu.matmul %7, %8, %cst_8 {dimension_numbers = #tpu.dot_dimension_numbers<[1], [0], [0], [1], [0, 0, 1, 1], [], []>} : vector<8x128xf32>, vector<128x64xf32>, vector<8x64xf32> -> vector<8x64xf32>
    %c0_9 = arith.constant 0 : index
    %c0_10 = arith.constant 0 : index
    %10 = vector.load %arg5[%c0_9, %c0_10] : memref<1x64xf32, #tpu.memory_space<vmem>>, vector<1x64xf32>
    %11 = vector.broadcast %10 : vector<1x64xf32> to vector<8x64xf32>
    %12 = arith.addf %9, %11 : vector<8x64xf32>
    %cst_11 = arith.constant 0.000000e+00 : f32
    %13 = vector.broadcast %cst_11 : f32 to vector<8x64xf32>
    %14 = arith.maximumf %12, %13 : vector<8x64xf32>
    %c0_12 = arith.constant 0 : index
    %c0_13 = arith.constant 0 : index
    %15 = vector.load %arg6[%c0_12, %c0_13] : memref<64x10xf32, #tpu.memory_space<vmem>>, vector<64x10xf32>
    %cst_14 = arith.constant dense<0.000000e+00> : vector<8x10xf32>
    %16 = tpu.matmul %14, %15, %cst_14 {dimension_numbers = #tpu.dot_dimension_numbers<[1], [0], [0], [1], [0, 0, 1, 1], [], []>} : vector<8x64xf32>, vector<64x10xf32>, vector<8x10xf32> -> vector<8x10xf32>
    %c0_15 = arith.constant 0 : index
    %c0_16 = arith.constant 0 : index
    %17 = vector.load %arg7[%c0_15, %c0_16] : memref<1x10xf32, #tpu.memory_space<vmem>>, vector<1x10xf32>
    %18 = vector.broadcast %17 : vector<1x10xf32> to vector<8x10xf32>
    %19 = arith.addf %16, %18 : vector<8x10xf32>
    %cst_17 = arith.constant 0.000000e+00 : f32
    %20 = vector.broadcast %cst_17 : f32 to vector<8x10xf32>
    %21 = arith.maximumf %19, %20 : vector<8x10xf32>
    %c0_18 = arith.constant 0 : index
    %c0_19 = arith.constant 0 : index
    %22 = vector.load %arg8[%c0_18, %c0_19] : memref<10x10xf32, #tpu.memory_space<vmem>>, vector<10x10xf32>
    %cst_20 = arith.constant dense<0.000000e+00> : vector<8x10xf32>
    %23 = tpu.matmul %21, %22, %cst_20 {dimension_numbers = #tpu.dot_dimension_numbers<[1], [0], [0], [1], [0, 0, 1, 1], [], []>} : vector<8x10xf32>, vector<10x10xf32>, vector<8x10xf32> -> vector<8x10xf32>
    %c0_21 = arith.constant 0 : index
    %c0_22 = arith.constant 0 : index
    %24 = vector.load %arg9[%c0_21, %c0_22] : memref<1x10xf32, #tpu.memory_space<vmem>>, vector<1x10xf32>
    %25 = vector.broadcast %24 : vector<1x10xf32> to vector<8x10xf32>
    %26 = arith.addf %23, %25 : vector<8x10xf32>
    %cst_23 = arith.constant 0.000000e+00 : f32
    %27 = vector.broadcast %cst_23 : f32 to vector<8x10xf32>
    %28 = arith.maximumf %26, %27 : vector<8x10xf32>
    %c0_24 = arith.constant 0 : index
    %c0_25 = arith.constant 0 : index
    %29 = vector.load %arg10[%c0_24, %c0_25] : memref<10x10xf32, #tpu.memory_space<vmem>>, vector<10x10xf32>
    %cst_26 = arith.constant dense<0.000000e+00> : vector<8x10xf32>
    %30 = tpu.matmul %28, %29, %cst_26 {dimension_numbers = #tpu.dot_dimension_numbers<[1], [0], [0], [1], [0, 0, 1, 1], [], []>} : vector<8x10xf32>, vector<10x10xf32>, vector<8x10xf32> -> vector<8x10xf32>
    %c0_27 = arith.constant 0 : index
    %c0_28 = arith.constant 0 : index
    %31 = vector.load %arg11[%c0_27, %c0_28] : memref<1x10xf32, #tpu.memory_space<vmem>>, vector<1x10xf32>
    %32 = vector.broadcast %31 : vector<1x10xf32> to vector<8x10xf32>
    %33 = arith.addf %30, %32 : vector<8x10xf32>
    %cst_29 = arith.constant 0.000000e+00 : f32
    %34 = vector.broadcast %cst_29 : f32 to vector<8x10xf32>
    %35 = arith.maximumf %33, %34 : vector<8x10xf32>
    %c0_30 = arith.constant 0 : index
    %c0_31 = arith.constant 0 : index
    %36 = vector.load %arg12[%c0_30, %c0_31] : memref<10x10xf32, #tpu.memory_space<vmem>>, vector<10x10xf32>
    %cst_32 = arith.constant dense<0.000000e+00> : vector<8x10xf32>
    %37 = tpu.matmul %35, %36, %cst_32 {dimension_numbers = #tpu.dot_dimension_numbers<[1], [0], [0], [1], [0, 0, 1, 1], [], []>} : vector<8x10xf32>, vector<10x10xf32>, vector<8x10xf32> -> vector<8x10xf32>
    %c0_33 = arith.constant 0 : index
    %c0_34 = arith.constant 0 : index
    %38 = vector.load %arg13[%c0_33, %c0_34] : memref<1x10xf32, #tpu.memory_space<vmem>>, vector<1x10xf32>
    %39 = vector.broadcast %38 : vector<1x10xf32> to vector<8x10xf32>
    %40 = arith.addf %37, %39 : vector<8x10xf32>
    %cst_35 = arith.constant dense<0xFF800000> : vector<8xf32>
    %41 = vector.multi_reduction <maximumf>, %40, %cst_35 [1] : vector<8x10xf32> to vector<8xf32>
    %42 = vector.shape_cast %41 : vector<8xf32> to vector<8x1xf32>
    %43 = vector.broadcast %42 : vector<8x1xf32> to vector<8x10xf32>
    %44 = arith.subf %40, %43 : vector<8x10xf32>
    %45 = math.exp %44 : vector<8x10xf32>
    %cst_36 = arith.constant dense<0.000000e+00> : vector<8xf32>
    %46 = vector.multi_reduction <add>, %45, %cst_36 [1] : vector<8x10xf32> to vector<8xf32>
    %47 = vector.shape_cast %46 : vector<8xf32> to vector<8x1xf32>
    %48 = math.log %47 : vector<8x1xf32>
    %49 = vector.broadcast %48 : vector<8x1xf32> to vector<8x10xf32>
    %50 = arith.subf %44, %49 : vector<8x10xf32>
    %c0_37 = arith.constant 0 : index
    %c0_38 = arith.constant 0 : index
    %51 = vector.load %arg14[%c0_37, %c0_38] : memref<8x10xf32, #tpu.memory_space<vmem>>, vector<8x10xf32>
    tpu.vector_store %arg14[%c0_37, %c0_38], %50 {strides = array<i32>} : memref<8x10xf32, #tpu.memory_space<vmem>>, vector<8x10xf32>,
    return
  }
  func.func @transform_0(%arg0: i32) -> (i32, i32) {
    %c0_i32 = arith.constant 0 : i32
    %c0_i32_0 = arith.constant 0 : i32
    return %arg0, %c0_i32 : i32, i32
  }
  func.func @transform_1(%arg0: i32) -> (i32, i32) {
    %c0_i32 = arith.constant 0 : i32
    %c0_i32_0 = arith.constant 0 : i32
    %c0_i32_1 = arith.constant 0 : i32
    return %c0_i32, %c0_i32_0 : i32, i32
  }
  func.func @transform_2(%arg0: i32) -> (i32, i32) {
    %c0_i32 = arith.constant 0 : i32
    %c0_i32_0 = arith.constant 0 : i32
    %c0_i32_1 = arith.constant 0 : i32
    return %c0_i32, %c0_i32_0 : i32, i32
  }
  func.func @transform_3(%arg0: i32) -> (i32, i32) {
    %c0_i32 = arith.constant 0 : i32
    %c0_i32_0 = arith.constant 0 : i32
    %c0_i32_1 = arith.constant 0 : i32
    return %c0_i32, %c0_i32_0 : i32, i32
  }
  func.func @transform_4(%arg0: i32) -> (i32, i32) {
    %c0_i32 = arith.constant 0 : i32
    %c0_i32_0 = arith.constant 0 : i32
    %c0_i32_1 = arith.constant 0 : i32
    return %c0_i32, %c0_i32_0 : i32, i32
  }
  func.func @transform_5(%arg0: i32) -> (i32, i32) {
    %c0_i32 = arith.constant 0 : i32
    %c0_i32_0 = arith.constant 0 : i32
    %c0_i32_1 = arith.constant 0 : i32
    return %c0_i32, %c0_i32_0 : i32, i32
  }
  func.func @transform_6(%arg0: i32) -> (i32, i32) {
    %c0_i32 = arith.constant 0 : i32
    %c0_i32_0 = arith.constant 0 : i32
    %c0_i32_1 = arith.constant 0 : i32
    return %c0_i32, %c0_i32_0 : i32, i32
  }
  func.func @transform_7(%arg0: i32) -> (i32, i32) {
    %c0_i32 = arith.constant 0 : i32
    %c0_i32_0 = arith.constant 0 : i32
    %c0_i32_1 = arith.constant 0 : i32
    return %c0_i32, %c0_i32_0 : i32, i32
  }
  func.func @transform_8(%arg0: i32) -> (i32, i32) {
    %c0_i32 = arith.constant 0 : i32
    %c0_i32_0 = arith.constant 0 : i32
    %c0_i32_1 = arith.constant 0 : i32
    return %c0_i32, %c0_i32_0 : i32, i32
  }
  func.func @transform_9(%arg0: i32) -> (i32, i32) {
    %c0_i32 = arith.constant 0 : i32
    %c0_i32_0 = arith.constant 0 : i32
    %c0_i32_1 = arith.constant 0 : i32
    return %c0_i32, %c0_i32_0 : i32, i32
  }
  func.func @transform_10(%arg0: i32) -> (i32, i32) {
    %c0_i32 = arith.constant 0 : i32
    %c0_i32_0 = arith.constant 0 : i32
    %c0_i32_1 = arith.constant 0 : i32
    return %c0_i32, %c0_i32_0 : i32, i32
  }
  func.func @transform_11(%arg0: i32) -> (i32, i32) {
    %c0_i32 = arith.constant 0 : i32
    %c0_i32_0 = arith.constant 0 : i32
    %c0_i32_1 = arith.constant 0 : i32
    return %c0_i32, %c0_i32_0 : i32, i32
  }
  func.func @transform_12(%arg0: i32) -> (i32, i32) {
    %c0_i32 = arith.constant 0 : i32
    %c0_i32_0 = arith.constant 0 : i32
    %c0_i32_1 = arith.constant 0 : i32
    return %c0_i32, %c0_i32_0 : i32, i32
  }
  func.func @transform_13(%arg0: i32) -> (i32, i32) {
    %c0_i32 = arith.constant 0 : i32
    %c0_i32_0 = arith.constant 0 : i32
    return %arg0, %c0_i32 : i32, i32
  }
}

</mosaic_0001>

<bundles_post_ra>
// kernel: tpu_custom_call.1
= control target key start
LH: loop header
LB: loop body
LE: loop exit
PB: predicated region body
PF: predicated region fallthrough
CT: control target
= control target key end

     0   :  { %18 = vsyncpa [#allocation3], 0  ;;  %s1652_s0 = inlined_call_operand.vmem [shape: f32[2,1024], index: 0, kind: input, shape index: {}]   ;;  %s1653_s1 = inlined_call_operand.hbm [shape: f32[1024,128], index: 1, kind: input, shape index: {}]   ;;  %s1654_s2 = inlined_call_operand.vmem [shape: f32[1,128], index: 2, kind: input, shape index: {}]   ;;  %s1655_s3 = inlined_call_operand.vmem [shape: f32[128,64], index: 3, kind: input, shape index: {}]   ;;  %s1656_s4 = inlined_call_operand.vmem [shape: f32[1,64], index: 4, kind: input, shape index: {}]   ;;  %s1657_s5 = inlined_call_operand.vmem [shape: f32[64,10], index: 5, kind: input, shape index: {}]   ;;  %s1658_s6 = inlined_call_operand.vmem [shape: f32[1,10], index: 6, kind: input, shape index: {}]   ;;  %s1659_s7 = inlined_call_operand.vmem [shape: f32[10,10], index: 7, kind: input, shape index: {}]   ;;  %s1660_s8 = inlined_call_operand.vmem [shape: f32[1,10], index: 8, kind: input, shape index: {}]   ;;  %s1661_s9 = inlined_call_operand.vmem [shape: f32[10,10], index: 9, kind: input, shape index: {}]   ;;  %s1662_s10 = inlined_call_operand.vmem [shape: f32[1,10], index: 10, kind: input, shape index: {}]   ;;  %s1663_s11 = inlined_call_operand.vmem [shape: f32[10,10], index: 11, kind: input, shape index: {}]   ;;  %s1664_s12 = inlined_call_operand.vmem [shape: f32[1,10], index: 12, kind: input, shape index: {}]   ;;  %s1665_s13 = inlined_call_operand.hbm [shape: f32[2,10], index: 13, kind: output, shape index: {}]  }
   0x1   :  { %19 = vsyncpa [#allocation4], 0  ;;  %s1376_s25 = smov [#allocation2]  }
   0x2   :  { %s27_s26 = sshll.u32 %s1376_s25, 4  ;;  %s28_s26 = int_to_ptr.vmem [resolvable:$true] %s27_s26 }
   0x3   :  { %s1340_s27 = scalar_lea.vmem %s28_s26, 16384  ;;  %p1345_p1 = scmp.lt.s32.totalorder %s28_s26, %s28_s26 }
   0x4   :  { %p1341_p0 = scmp.ne.s32.totalorder %s28_s26, %s1340_s27  ;;  %p1346_p2 = scmp.lt.s32.totalorder %s1340_s27, %s1340_s27 }
   0x6   :  { %p1347_p3 = por %p1346_p2, %p1345_p1 }
   0x8   :  { %p1348_p4 = pnand %p1347_p3, %p1341_p0 }
   0xa   :  { %1351 = shalt.err (!%p1348_p4)
}
   0xb   :  { %s1377_s28 = smov 128   ;;  %s1378_s29 = smov 8  }
   0xc   :  { %33 = dma.hbm_to_vmem [thread:$0]  %s1653_s1, 16384, %s28_s26, [#allocation3], %s1377_s28, %s1377_s28, %s1378_s29  }
   0xd   :  { %1372 = dma.done.wait [#allocation3], 16384  }
   0xe   :  { %1373 = vsyncadd [#allocation3], 4294950912  ;;  %v98_v0 = vld [vmem:[#allocation2 + $0xf8] sm:$0xff]  ;;  %v97_v4 = vld [vmem:[#allocation2 + $0xf0] sm:$0xff]  ;;  %v1379_v30 = vmov 1983009808   ;;  %v217_v32 = vlaneseq }
   0xf   :  { %v130_v1 = vld [vmem:[#allocation2 + $0x1f8] sm:$0xff]  ;;  %1057 = vmatprep.subr.mxu0 %v98_v0  ;;  %v129_v5 = vld [vmem:[#allocation2 + $0x1f0] sm:$0xff]  ;;  %v96_v8 = vld [vmem:[#allocation2 + $0xe8] sm:$0xff]  ;;  %v215_v31 = vunpack.c.l.s4 %v1379_v30  ;;  %vm1381_vm0 = vmmov 0   ;;  %vm680_vm1 = vcmask 523264   ;;  %vm768_vm2 = vcmask 1041408  }
  0x10   :  { %v82_v2 = vld [vmem:[#allocation2 + $0x78] sm:$0xff]  ;;  %1092 = vmatprep.subr.mxu1 %v130_v1  ;;  %v81_v6 = vld [vmem:[#allocation2 + $0x70] sm:$0xff]  ;;  %v128_v9 = vld [vmem:[#allocation2 + $0x1e8] sm:$0xff]  ;;  %v218_v42 = vshrl.u32 %v217_v32, 7  ;;  %vm764_vm3 = vcmask 80896  }
  0x11   :  { %v114_v3 = vld [vmem:[#allocation2 + $0x178] sm:$0xff]  ;;  %1058 = vmatpush3.msra.mxu0 %v82_v2  ;;  %v113_v7 = vld [vmem:[#allocation2 + $0x170] sm:$0xff]  ;;  %v80_v10 = vld [vmem:[#allocation2 + $0x68] sm:$0xff]  ;;  %v216_v41 = vunpack.c.0.s8 %v215_v31 }
  0x12   :  { %1093 = vmatpush3.msra.mxu1 %v114_v3  ;;  %1059 = vmatprep.subr.mxu0 %v97_v4  ;;  %v112_v11 = vld [vmem:[#allocation2 + $0x168] sm:$0xff]  ;;  %v95_v12 = vld [vmem:[#allocation2 + $0xe0] sm:$0xff]  ;;  %v94_v16 = vld [vmem:[#allocation2 + $0xd8] sm:$0xff] }
  0x13   :  { %1094 = vmatprep.subr.mxu1 %v129_v5  ;;  %1060 = vmatpush3.msra.mxu0 %v81_v6  ;;  %v127_v13 = vld [vmem:[#allocation2 + $0x1e0] sm:$0xff]  ;;  %v126_v17 = vld [vmem:[#allocation2 + $0x1d8] sm:$0xff]  ;;  %v93_v20 = vld [vmem:[#allocation2 + $0xd0] sm:$0xff]  ;;  %v1458_v55 = vsub.s32 %v216_v41, %v218_v42 }
  0x14   :  { %1095 = vmatpush3.msra.mxu1 %v113_v7  ;;  %1061 = vmatprep.subr.mxu0 %v96_v8  ;;  %v79_v14 = vld [vmem:[#allocation2 + $0x60] sm:$0xff]  ;;  %v78_v18 = vld [vmem:[#allocation2 + $0x58] sm:$0xff]  ;;  %v125_v21 = vld [vmem:[#allocation2 + $0x1d0] sm:$0xff] }
  0x15   :  { %1096 = vmatprep.subr.mxu1 %v128_v9  ;;  %v111_v15 = vld [vmem:[#allocation2 + $0x160] sm:$0xff]  ;;  %1062 = vmatpush3.msra.mxu0 %v80_v10  ;;  %v110_v19 = vld [vmem:[#allocation2 + $0x158] sm:$0xff]  ;;  %v77_v22 = vld [vmem:[#allocation2 + $0x50] sm:$0xff] }
  0x16   :  { %1097 = vmatpush3.msra.mxu1 %v112_v11  ;;  %1063 = vmatprep.subr.mxu0 %v95_v12  ;;  %v109_v23 = vld [vmem:[#allocation2 + $0x150] sm:$0xff]  ;;  %v92_v24 = vld [vmem:[#allocation2 + $0xc8] sm:$0xff]  ;;  %v91_v28 = vld [vmem:[#allocation2 + $0xc0] sm:$0xff] }
  0x17   :  { %1098 = vmatprep.subr.mxu1 %v127_v13  ;;  %1064 = vmatpush3.msra.mxu0 %v79_v14  ;;  %v124_v25 = vld [vmem:[#allocation2 + $0x1c8] sm:$0xff]  ;;  %v123_v29 = vld [vmem:[#allocation2 + $0x1c0] sm:$0xff]  ;;  %v90_v35 = vld [vmem:[#allocation2 + $0xb8] sm:$0xff] }
  0x18   :  { %1099 = vmatpush3.msra.mxu1 %v111_v15  ;;  %1065 = vmatprep.subr.mxu0 %v94_v16  ;;  %v76_v26 = vld [vmem:[#allocation2 + $0x48] sm:$0xff]  ;;  %v75_v33 = vld [vmem:[#allocation2 + $0x40] sm:$0xff]  ;;  %v122_v36 = vld [vmem:[#allocation2 + $0x1b8] sm:$0xff] }
  0x19   :  { %1100 = vmatprep.subr.mxu1 %v126_v17  ;;  %1066 = vmatpush3.msra.mxu0 %v78_v18  ;;  %v108_v27 = vld [vmem:[#allocation2 + $0x148] sm:$0xff]  ;;  %v107_v34 = vld [vmem:[#allocation2 + $0x140] sm:$0xff]  ;;  %v74_v37 = vld [vmem:[#allocation2 + $0x38] sm:$0xff] }
  0x1a   :  { %1101 = vmatpush3.msra.mxu1 %v110_v19  ;;  %1067 = vmatprep.subr.mxu0 %v93_v20  ;;  %v106_v38 = vld [vmem:[#allocation2 + $0x138] sm:$0xff]  ;;  %v89_v39 = vld [vmem:[#allocation2 + $0xb0] sm:$0xff]  ;;  %v88_v45 = vld [vmem:[#allocation2 + $0xa8] sm:$0xff] }
  0x1b   :  { %1102 = vmatprep.subr.mxu1 %v125_v21  ;;  %1068 = vmatpush3.msra.mxu0 %v77_v22  ;;  %v121_v40 = vld [vmem:[#allocation2 + $0x1b0] sm:$0xff]  ;;  %v120_v46 = vld [vmem:[#allocation2 + $0x1a8] sm:$0xff]  ;;  %v87_v49 = vld [vmem:[#allocation2 + $0xa0] sm:$0xff] }
  0x1c   :  { %1103 = vmatpush3.msra.mxu1 %v109_v23  ;;  %1069 = vmatprep.subr.mxu0 %v92_v24  ;;  %v73_v43 = vld [vmem:[#allocation2 + $0x30] sm:$0xff]  ;;  %v72_v47 = vld [vmem:[#allocation2 + $0x28] sm:$0xff]  ;;  %v119_v50 = vld [vmem:[#allocation2 + $0x1a0] sm:$0xff] }
  0x1d   :  { %1104 = vmatprep.subr.mxu1 %v124_v25  ;;  %1070 = vmatpush3.msra.mxu0 %v76_v26  ;;  %v105_v44 = vld [vmem:[#allocation2 + $0x130] sm:$0xff]  ;;  %v104_v48 = vld [vmem:[#allocation2 + $0x128] sm:$0xff]  ;;  %v71_v51 = vld [vmem:[#allocation2 + $0x20] sm:$0xff] }
  0x1e   :  { %1105 = vmatpush3.msra.mxu1 %v108_v27  ;;  %1071 = vmatprep.subr.mxu0 %v91_v28  ;;  %v103_v52 = vld [vmem:[#allocation2 + $0x120] sm:$0xff]  ;;  %v86_v53 = vld [vmem:[#allocation2 + $0x98] sm:$0xff]  ;;  %v85_v62 = vld [vmem:[#allocation2 + $0x90] sm:$0xff] }
  0x1f   :  { %1106 = vmatprep.subr.mxu1 %v123_v29  ;;  %1072 = vmatpush3.msra.mxu0 %v75_v33  ;;  %v118_v54 = vld [vmem:[#allocation2 + $0x198] sm:$0xff]  ;;  %v1316_v57 = vld [vmem:[%s1652_s0] ss:$16 sps:$4 sm:$0xff]   ;;  %v1320_v60 = vld [vmem:[%s1652_s0 + $0x4] ss:$16 sps:$4 sm:$0xff]  }
  0x20   :  { %1107 = vmatpush3.msra.mxu1 %v107_v34  ;;  %1073 = vmatprep.subr.mxu0 %v90_v35  ;;  %v70_v56 = vld [vmem:[#allocation2 + $0x18] sm:$0xff]  ;;  %v1318_v58 = vld [vmem:[%s1652_s0 + $0x20] ss:$16 sps:$4 sm:$0xff]   ;;  %v1321_v61 = vld [vmem:[%s1652_s0 + $0x24] ss:$16 sps:$4 sm:$0xff]   ;;  %v220_v0 = vrot.slane %v1316_v57, %v1458_v55  ;;  %v227_v6 = vrot.slane %v1320_v60, %v1458_v55 }
  0x21   :  { %1108 = vmatprep.subr.mxu1 %v122_v36  ;;  %1074 = vmatpush3.msra.mxu0 %v74_v37  ;;  %v102_v59 = vld [vmem:[#allocation2 + $0x118] sm:$0xff]  ;;  %v117_v63 = vld [vmem:[#allocation2 + $0x190] sm:$0xff]  ;;  %v234_v1 = vrot.slane %v1318_v58, %v1458_v55  ;;  %v84_v4 = vld [vmem:[#allocation2 + $0x88] sm:$0xff]  ;;  %v241_v7 = vrot.slane %v1321_v61, %v1458_v55 }
  0x22   :  { %1109 = vmatpush3.msra.mxu1 %v106_v38  ;;  %1075 = vmatprep.subr.mxu0 %v89_v39  ;;  %v69_v2 = vld [vmem:[#allocation2 + $0x10] sm:$0xff]  ;;  %v116_v5 = vld [vmem:[#allocation2 + $0x188] sm:$0xff]  ;;  %v83_v10 = vld [vmem:[#allocation2 + $0x80] sm:$0xff] }
  0x23   :  { %1110 = vmatprep.subr.mxu1 %v121_v40  ;;  %1076 = vmatpush3.msra.mxu0 %v73_v43  ;;  %v101_v3 = vld [vmem:[#allocation2 + $0x110] sm:$0xff]  ;;  %v68_v8 = vld [vmem:[#allocation2 + $0x8] sm:$0xff]  ;;  %v115_v11 = vld [vmem:[#allocation2 + $0x180] sm:$0xff]  ;;  %v243_v12 = vcombine.high %v220_v0, %v234_v1  ;;  %v242_v14 = vcombine.low %v220_v0, %v234_v1  ;;  %v245_v16 = vcombine.high %v227_v6, %v241_v7 }
  0x24   :  { %1111 = vmatpush3.msra.mxu1 %v105_v44  ;;  %1077 = vmatprep.subr.mxu0 %v88_v45  ;;  %v100_v9 = vld [vmem:[#allocation2 + $0x108] sm:$0xff]  ;;  %v67_v13 = vld [vmem:[#allocation2] sm:$0xff]  ;;  %v162_v17 = vld [vmem:[#allocation2 + $0x2f8] sm:$0xff]  ;;  %v244_v18 = vcombine.low %v227_v6, %v241_v7 }
  0x25   :  { %1112 = vmatprep.subr.mxu1 %v120_v46  ;;  %1078 = vmatpush3.msra.mxu0 %v72_v47  ;;  %v99_v15 = vld [vmem:[#allocation2 + $0x100] sm:$0xff]  ;;  %v194_v19 = vld [vmem:[#allocation2 + $0x3f8] sm:$0xff]  ;;  %v161_v22 = vld [vmem:[#allocation2 + $0x2f0] sm:$0xff] }
  0x26   :  { %1113 = vmatpush3.msra.mxu1 %v104_v48  ;;  %1079 = vmatprep.subr.mxu0 %v87_v49  ;;  %v146_v20 = vld [vmem:[#allocation2 + $0x278] sm:$0xff]  ;;  %v193_v23 = vld [vmem:[#allocation2 + $0x3f0] sm:$0xff]  ;;  %v160_v26 = vld [vmem:[#allocation2 + $0x2e8] sm:$0xff] }
  0x27   :  { %1114 = vmatprep.subr.mxu1 %v119_v50  ;;  %1080 = vmatpush3.msra.mxu0 %v71_v51  ;;  %v178_v21 = vld [vmem:[#allocation2 + $0x378] sm:$0xff]  ;;  %v145_v24 = vld [vmem:[#allocation2 + $0x270] sm:$0xff]  ;;  %v192_v27 = vld [vmem:[#allocation2 + $0x3e8] sm:$0xff] }
  0x28   :  { %1115 = vmatpush3.msra.mxu1 %v103_v52  ;;  %1081 = vmatprep.subr.mxu0 %v86_v53  ;;  %v177_v25 = vld [vmem:[#allocation2 + $0x370] sm:$0xff]  ;;  %v144_v28 = vld [vmem:[#allocation2 + $0x268] sm:$0xff]  ;;  %v159_v30 = vld [vmem:[#allocation2 + $0x2e0] sm:$0xff] }
  0x29   :  { %1116 = vmatprep.subr.mxu1 %v118_v54  ;;  %1082 = vmatpush3.msra.mxu0 %v70_v56  ;;  %v176_v29 = vld [vmem:[#allocation2 + $0x368] sm:$0xff]  ;;  %v191_v31 = vld [vmem:[#allocation2 + $0x3e0] sm:$0xff]  ;;  %v158_v34 = vld [vmem:[#allocation2 + $0x2d8] sm:$0xff] }
  0x2a   :  { %1117 = vmatpush3.msra.mxu1 %v102_v59  ;;  %1083 = vmatprep.subr.mxu0 %v85_v62  ;;  %v143_v32 = vld [vmem:[#allocation2 + $0x260] sm:$0xff]  ;;  %v190_v35 = vld [vmem:[#allocation2 + $0x3d8] sm:$0xff]  ;;  %v157_v38 = vld [vmem:[#allocation2 + $0x2d0] sm:$0xff] }
  0x2b   :  { %1118 = vmatprep.subr.mxu1 %v117_v63  ;;  %1084 = vmatpush3.msra.mxu0 %v69_v2  ;;  %v175_v33 = vld [vmem:[#allocation2 + $0x360] sm:$0xff]  ;;  %v142_v36 = vld [vmem:[#allocation2 + $0x258] sm:$0xff]  ;;  %v189_v39 = vld [vmem:[#allocation2 + $0x3d0] sm:$0xff] }
  0x2c   :  { %1119 = vmatpush3.msra.mxu1 %v101_v3  ;;  %1085 = vmatprep.subr.mxu0 %v84_v4  ;;  %v174_v37 = vld [vmem:[#allocation2 + $0x358] sm:$0xff]  ;;  %v141_v40 = vld [vmem:[#allocation2 + $0x250] sm:$0xff]  ;;  %v156_v42 = vld [vmem:[#allocation2 + $0x2c8] sm:$0xff] }
  0x2d   :  { %1120 = vmatprep.subr.mxu1 %v116_v5  ;;  %1086 = vmatpush3.msra.mxu0 %v68_v8  ;;  %v173_v41 = vld [vmem:[#allocation2 + $0x350] sm:$0xff]  ;;  %v188_v43 = vld [vmem:[#allocation2 + $0x3c8] sm:$0xff]  ;;  %v155_v46 = vld [vmem:[#allocation2 + $0x2c0] sm:$0xff] }
  0x2e   :  { %1121 = vmatpush3.msra.mxu1 %v100_v9  ;;  %1087 = vmatprep.subr.mxu0 %v83_v10  ;;  %v140_v44 = vld [vmem:[#allocation2 + $0x248] sm:$0xff]  ;;  %v187_v47 = vld [vmem:[#allocation2 + $0x3c0] sm:$0xff]  ;;  %v154_v50 = vld [vmem:[#allocation2 + $0x2b8] sm:$0xff] }
  0x2f   :  { %1122 = vmatprep.subr.mxu1 %v115_v11  ;;  %1088 = vmatpush3.msra.mxu0 %v67_v13  ;;  %v172_v45 = vld [vmem:[#allocation2 + $0x348] sm:$0xff]  ;;  %v139_v48 = vld [vmem:[#allocation2 + $0x240] sm:$0xff]  ;;  %v186_v51 = vld [vmem:[#allocation2 + $0x3b8] sm:$0xff] }
  0x30   :  { %354 = vmatprep.mubr.f32.mxu0 %v243_v12  ;;  %1123 = vmatpush3.msra.mxu1 %v99_v15  ;;  %v171_v49 = vld [vmem:[#allocation2 + $0x340] sm:$0xff]  ;;  %v138_v52 = vld [vmem:[#allocation2 + $0x238] sm:$0xff]  ;;  %v153_v54 = vld [vmem:[#allocation2 + $0x2b0] sm:$0xff] }
  0x31   :  { %355 = vmatmul.mubr.f32.vlgmr.msra.gmra.mxu0 %v242_v14  ;;  %424 = vmatprep.mubr.f32.mxu1 %v245_v16  ;;  %v170_v53 = vld [vmem:[#allocation2 + $0x338] sm:$0xff]  ;;  %v185_v56 = vld [vmem:[#allocation2 + $0x3b0] sm:$0xff]  ;;  %v152_v59 = vld [vmem:[#allocation2 + $0x2a8] sm:$0xff] }
  0x32   :  { %1127 = vmatprep.subr.mxu0 %v162_v17  ;;  %1162 = vmatprep.subr.mxu1 %v194_v19  ;;  %v137_v57 = vld [vmem:[#allocation2 + $0x230] sm:$0xff]  ;;  %v184_v60 = vld [vmem:[#allocation2 + $0x3a8] sm:$0xff]  ;;  %v151_v63 = vld [vmem:[#allocation2 + $0x2a0] sm:$0xff] }
  0x33   :  { %425 = vmatmul.mubr.f32.vlgmr.msra.gmra.mxu1 %v244_v18  ;;  %1128 = vmatpush3.msra.mxu0 %v146_v20  ;;  %v169_v58 = vld [vmem:[#allocation2 + $0x330] sm:$0xff]  ;;  %v136_v61 = vld [vmem:[#allocation2 + $0x228] sm:$0xff]  ;;  %v183_v0 = vld [vmem:[#allocation2 + $0x3a0] sm:$0xff] }
  0x34   :  { %1163 = vmatpush3.msra.mxu1 %v178_v21  ;;  %1129 = vmatprep.subr.mxu0 %v161_v22  ;;  %v168_v62 = vld [vmem:[#allocation2 + $0x328] sm:$0xff]  ;;  %v135_v1 = vld [vmem:[#allocation2 + $0x220] sm:$0xff]  ;;  %v150_v7 = vld [vmem:[#allocation2 + $0x298] sm:$0xff] }
  0x35   :  { %1164 = vmatprep.subr.mxu1 %v193_v23  ;;  %1130 = vmatpush3.msra.mxu0 %v145_v24  ;;  %v1322_v2 = vld [vmem:[%s1652_s0 + $0x8] ss:$16 sps:$4 sm:$0xff]   ;;  %v167_v4 = vld [vmem:[#allocation2 + $0x320] sm:$0xff]  ;;  %v1326_v5 = vld [vmem:[%s1652_s0 + $0xc] ss:$16 sps:$4 sm:$0xff]  }
  0x36   :  { %1165 = vmatpush3.msra.mxu1 %v177_v25  ;;  %1131 = vmatprep.subr.mxu0 %v160_v26  ;;  %v1324_v3 = vld [vmem:[%s1652_s0 + $0x28] ss:$16 sps:$4 sm:$0xff]   ;;  %v1327_v6 = vld [vmem:[%s1652_s0 + $0x2c] ss:$16 sps:$4 sm:$0xff]   ;;  %v149_v11 = vld [vmem:[#allocation2 + $0x290] sm:$0xff]  ;;  %v256_v13 = vrot.slane %v1322_v2, %v1458_v55  ;;  %v263_v17 = vrot.slane %v1326_v5, %v1458_v55 }
  0x37   :  { %1166 = vmatprep.subr.mxu1 %v192_v27  ;;  %1132 = vmatpush3.msra.mxu0 %v144_v28  ;;  %v182_v8 = vld [vmem:[#allocation2 + $0x398] sm:$0xff]  ;;  %v181_v12 = vld [vmem:[#allocation2 + $0x390] sm:$0xff]  ;;  %v270_v14 = vrot.slane %v1324_v3, %v1458_v55  ;;  %v277_v18 = vrot.slane %v1327_v6, %v1458_v55  ;;  %v148_v19 = vld [vmem:[#allocation2 + $0x288] sm:$0xff] }
  0x38   :  { %1167 = vmatpush3.msra.mxu1 %v176_v29  ;;  %1133 = vmatprep.subr.mxu0 %v159_v30  ;;  %v134_v9 = vld [vmem:[#allocation2 + $0x218] sm:$0xff]  ;;  %v133_v15 = vld [vmem:[#allocation2 + $0x210] sm:$0xff]  ;;  %v180_v20 = vld [vmem:[#allocation2 + $0x388] sm:$0xff] }
  0x39   :  { %1168 = vmatprep.subr.mxu1 %v191_v31  ;;  %1134 = vmatpush3.msra.mxu0 %v143_v32  ;;  %v166_v10 = vld [vmem:[#allocation2 + $0x318] sm:$0xff]  ;;  %v165_v16 = vld [vmem:[#allocation2 + $0x310] sm:$0xff]  ;;  %v132_v21 = vld [vmem:[#allocation2 + $0x208] sm:$0xff]  ;;  %v279_v25 = vcombine.high %v256_v13, %v270_v14  ;;  %v281_v27 = vcombine.high %v263_v17, %v277_v18  ;;  %v278_v28 = vcombine.low %v256_v13, %v270_v14  ;;  %v1380_v31 = vmov 0.0  }
  0x3a   :  { %1169 = vmatpush3.msra.mxu1 %v175_v33  ;;  %1135 = vmatprep.subr.mxu0 %v158_v34  ;;  %v164_v22 = vld [vmem:[#allocation2 + $0x308] sm:$0xff]  ;;  %v147_v23 = vld [vmem:[#allocation2 + $0x280] sm:$0xff]  ;;  %v280_v29 = vcombine.low %v263_v17, %v277_v18  ;;  %v586_v30 = vld [vmem:[%s1655_s3 + $0x78] sm:$0xff] }
  0x3b   :  { %1170 = vmatprep.subr.mxu1 %v190_v35  ;;  %1136 = vmatpush3.msra.mxu0 %v142_v36  ;;  %v179_v24 = vld [vmem:[#allocation2 + $0x380] sm:$0xff]  ;;  %v585_v32 = vld [vmem:[%s1655_s3 + $0x70] sm:$0xff]  ;;  %v584_v33 = vld [vmem:[%s1655_s3 + $0x68] sm:$0xff] }
  0x3c   :  { %1171 = vmatpush3.msra.mxu1 %v174_v37  ;;  %1137 = vmatprep.subr.mxu0 %v157_v38  ;;  %v131_v26 = vld [vmem:[#allocation2 + $0x200] sm:$0xff]  ;;  %v582_v35 = vld [vmem:[%s1655_s3 + $0x58] sm:$0xff]  ;;  %v581_v36 = vld [vmem:[%s1655_s3 + $0x50] sm:$0xff] }
  0x3d   :  { %1172 = vmatprep.subr.mxu1 %v189_v39  ;;  %1138 = vmatpush3.msra.mxu0 %v141_v40  ;;  %v163_v55 = vld [vmem:[#allocation2 + $0x300] sm:$0xff]  ;;  %v580_v37 = vld [vmem:[%s1655_s3 + $0x48] sm:$0xff]  ;;  %v578_v39 = vld [vmem:[%s1655_s3 + $0x38] sm:$0xff] }
  0x3e   :  { %1173 = vmatpush3.msra.mxu1 %v173_v41  ;;  %1139 = vmatprep.subr.mxu0 %v156_v42  ;;  %v583_v34 = vld [vmem:[%s1655_s3 + $0x60] sm:$0xff]  ;;  %v577_v40 = vld [vmem:[%s1655_s3 + $0x30] sm:$0xff]  ;;  %v576_v41 = vld [vmem:[%s1655_s3 + $0x28] sm:$0xff] }
  0x3f   :  { %1174 = vmatprep.subr.mxu1 %v188_v43  ;;  %1140 = vmatpush3.msra.mxu0 %v140_v44  ;;  %v579_v38 = vld [vmem:[%s1655_s3 + $0x40] sm:$0xff]  ;;  %v574_v43 = vld [vmem:[%s1655_s3 + $0x18] sm:$0xff]  ;;  %v573_v44 = vld [vmem:[%s1655_s3 + $0x10] sm:$0xff] }
  0x40   :  { %1175 = vmatpush3.msra.mxu1 %v172_v45  ;;  %1141 = vmatprep.subr.mxu0 %v155_v46  ;;  %v575_v42 = vld [vmem:[%s1655_s3 + $0x20] sm:$0xff]  ;;  %v572_v45 = vld [vmem:[%s1655_s3 + $0x8] sm:$0xff] }
  0x41   :  { %1176 = vmatprep.subr.mxu1 %v187_v47  ;;  %1142 = vmatpush3.msra.mxu0 %v139_v48  ;;  %v571_v46 = vld [vmem:[%s1655_s3] sm:$0xff]  ;;  %v672_v47 = vld [vmem:[%s1657_s5 + $0x38] sm:$0xff]  ;;  %v671_v48 = vld [vmem:[%s1657_s5 + $0x30] sm:$0xff] }
  0x42   :  { %1177 = vmatpush3.msra.mxu1 %v171_v49  ;;  %1143 = vmatprep.subr.mxu0 %v154_v50  ;;  %v670_v49 = vld [vmem:[%s1657_s5 + $0x28] sm:$0xff]  ;;  %v669_v50 = vld [vmem:[%s1657_s5 + $0x20] sm:$0xff] }
  0x43   :  { %1178 = vmatprep.subr.mxu1 %v186_v51  ;;  %1144 = vmatpush3.msra.mxu0 %v138_v52  ;;  %v668_v51 = vld [vmem:[%s1657_s5 + $0x18] sm:$0xff]  ;;  %v1046_v17 = vld [vmem:[%s1658_s6] ss:$0 sm:$0xff] }
  0x44   :  { %1179 = vmatpush3.msra.mxu1 %v170_v53  ;;  %1145 = vmatprep.subr.mxu0 %v153_v54 }
  0x45   :  { %1180 = vmatprep.subr.mxu1 %v185_v56  ;;  %1146 = vmatpush3.msra.mxu0 %v137_v57  ;;  %v1044_v57 = vld [vmem:[%s1654_s2] ss:$0 sm:$0xff] }
  0x46   :  { %1181 = vmatpush3.msra.mxu1 %v169_v58  ;;  %1147 = vmatprep.subr.mxu0 %v152_v59 }
  0x47   :  { %1182 = vmatprep.subr.mxu1 %v184_v60  ;;  %1148 = vmatpush3.msra.mxu0 %v136_v61 }
  0x48   :  { %1183 = vmatpush3.msra.mxu1 %v168_v62  ;;  %1149 = vmatprep.subr.mxu0 %v151_v63 }
  0x49   :  { %1184 = vmatprep.subr.mxu1 %v183_v0  ;;  %1150 = vmatpush3.msra.mxu0 %v135_v1 }
  0x4a   :  { %1185 = vmatpush3.msra.mxu1 %v167_v4  ;;  %1151 = vmatprep.subr.mxu0 %v150_v7  ;;  %v667_v7 = vld [vmem:[%s1657_s5 + $0x10] sm:$0xff] }
  0x4b   :  { %1186 = vmatprep.subr.mxu1 %v182_v8  ;;  %1152 = vmatpush3.msra.mxu0 %v134_v9  ;;  %v666_v8 = vld [vmem:[%s1657_s5 + $0x8] sm:$0xff]  ;;  %v665_v9 = vld [vmem:[%s1657_s5] sm:$0xff] }
  0x4c   :  { %1187 = vmatpush3.msra.mxu1 %v166_v10  ;;  %1153 = vmatprep.subr.mxu0 %v149_v11  ;;  %v1045_v10 = vld [vmem:[%s1656_s4] ss:$0 sm:$0xff] }
  0x4d   :  { %1188 = vmatprep.subr.mxu1 %v181_v12  ;;  %1154 = vmatpush3.msra.mxu0 %v133_v15  ;;  %v756_v15 = vld [vmem:[%s1659_s7 + $0x8] sm:$0x3] }
  0x4e   :  { %1189 = vmatpush3.msra.mxu1 %v165_v16  ;;  %1155 = vmatprep.subr.mxu0 %v148_v19  ;;  %v755_v16 = vld [vmem:[%s1659_s7] sm:$0xff] }
  0x4f   :  { %1190 = vmatprep.subr.mxu1 %v180_v20  ;;  %1156 = vmatpush3.msra.mxu0 %v132_v21 }
  0x50   :  { %1191 = vmatpush3.msra.mxu1 %v164_v22  ;;  %1157 = vmatprep.subr.mxu0 %v147_v23  ;;  %v844_v22 = vld [vmem:[%s1661_s9 + $0x8] sm:$0x3]  ;;  %v843_v23 = vld [vmem:[%s1661_s9] sm:$0xff] }
  0x51   :  { %1192 = vmatprep.subr.mxu1 %v179_v24  ;;  %1158 = vmatpush3.msra.mxu0 %v131_v26  ;;  %v1048_v24 = vld [vmem:[%s1660_s8] ss:$0 sm:$0xff] }
  0x52   :  { %494 = vmatprep.mubr.f32.mxu0 %v279_v25  ;;  %1193 = vmatpush3.msra.mxu1 %v163_v55 }
  0x53   :  { %564 = vmatprep.mubr.f32.mxu1 %v281_v27  ;;  %495 = vmatmul.mubr.f32.vlgmr.msra.gmra.mxu0 %v278_v28  ;;  %v930_v28 = vld [vmem:[%s1663_s11 + $0x8] sm:$0x3] }
  0x54   :  { %565 = vmatmul.mubr.f32.vlgmr.msra.gmra.mxu1 %v280_v29  ;;  %1232 = vmatprep.subr.mxu0 %v1380_v31  ;;  %v929_v29 = vld [vmem:[%s1663_s11] sm:$0xff] }
  0x55   :  { %1267 = vmatprep.subr.mxu1 %v1380_v31  ;;  %1233 = vmatpush3.msra.mxu0 %v586_v30  ;;  %v1051_v30 = vld [vmem:[%s1662_s10] ss:$0 sm:$0xff] }
  0x56   :  { %1234 = vmatprep.subr.mxu0 %v1380_v31  ;;  %1264 = vmatprep.mubr.msk.f32.mxu0 %vm1381_vm0, %v1380_v31 }
  0x57   :  { %1235 = vmatpush3.msra.mxu0 %v585_v32  ;;  %1283 = vmatprep.mubr.msk.f32.mxu1 %vm1381_vm0, %v1380_v31 }
  0x58   :  { %1236 = vmatprep.subr.mxu0 %v1380_v31  ;;  %1268 = vmatpush3.msra.mxu1 %v672_v47 }
  0x59   :  { %1237 = vmatpush3.msra.mxu0 %v584_v33  ;;  %1269 = vmatprep.subr.mxu1 %v1380_v31 }
  0x5a   :  { %1238 = vmatprep.subr.mxu0 %v1380_v31  ;;  %1270 = vmatpush3.msra.mxu1 %v671_v48 }
  0x5b   :  { %1239 = vmatpush3.msra.mxu0 %v583_v34  ;;  %1271 = vmatprep.subr.mxu1 %v1380_v31 }
  0x5c   :  { %1240 = vmatprep.subr.mxu0 %v1380_v31  ;;  %1272 = vmatpush3.msra.mxu1 %v670_v49 }
  0x5d   :  { %1241 = vmatpush3.msra.mxu0 %v582_v35  ;;  %1273 = vmatprep.subr.mxu1 %v1380_v31 }
  0x5e   :  { %1242 = vmatprep.subr.mxu0 %v1380_v31  ;;  %1274 = vmatpush3.msra.mxu1 %v669_v50 }
  0x5f   :  { %1243 = vmatpush3.msra.mxu0 %v581_v36  ;;  %1275 = vmatprep.subr.mxu1 %v1380_v31  ;;  %v1054_v36 = vld [vmem:[%s1664_s12] ss:$0 sm:$0xff] }
  0x60   :  { %1244 = vmatprep.subr.mxu0 %v1380_v31  ;;  %1276 = vmatpush3.msra.mxu1 %v668_v51 }
  0x61   :  { %1245 = vmatpush3.msra.mxu0 %v580_v37  ;;  %1277 = vmatprep.subr.mxu1 %v1380_v31 }
  0x62   :  { %1246 = vmatprep.subr.mxu0 %v1380_v31  ;;  %1278 = vmatpush3.msra.mxu1 %v667_v7 }
  0x63   :  { %1247 = vmatpush3.msra.mxu0 %v579_v38  ;;  %1279 = vmatprep.subr.mxu1 %v1380_v31 }
  0x64   :  { %1248 = vmatprep.subr.mxu0 %v1380_v31  ;;  %1280 = vmatpush3.msra.mxu1 %v666_v8 }
  0x65   :  { %1249 = vmatpush3.msra.mxu0 %v578_v39  ;;  %1281 = vmatprep.subr.mxu1 %v1380_v31 }
  0x66   :  { %1250 = vmatprep.subr.mxu0 %v1380_v31  ;;  %1282 = vmatpush3.msra.mxu1 %v665_v9 }
  0x67   :  { %1251 = vmatpush3.msra.mxu0 %v577_v40  ;;  %1286 = vmatprep.subr.mxu1 %v1380_v31 }
  0x68   :  { %1252 = vmatprep.subr.mxu0 %v1380_v31 }
  0x69   :  { %1253 = vmatpush3.msra.mxu0 %v576_v41 }
  0x6a   :  { %1254 = vmatprep.subr.mxu0 %v1380_v31 }
  0x6b   :  { %1255 = vmatpush3.msra.mxu0 %v575_v42 }
  0x6c   :  { %1256 = vmatprep.subr.mxu0 %v1380_v31 }
  0x6d   :  { %1257 = vmatpush3.msra.mxu0 %v574_v43 }
  0x6e   :  { %1258 = vmatprep.subr.mxu0 %v1380_v31 }
  0x6f   :  { %1259 = vmatpush3.msra.mxu0 %v573_v44 }
  0x70   :  { %1260 = vmatprep.subr.mxu0 %v1380_v31 }
  0x71   :  { %1261 = vmatpush3.msra.mxu0 %v572_v45 }
  0x72   :  { %1262 = vmatprep.subr.mxu0 %v1380_v31 }
  0x73   :  { %1263 = vmatpush3.msra.mxu0 %v571_v46 }
  0xf1   :  { %v1089_v52 = vpop.f32.mrf.mxu0 }
  0xf3   :  { %v1124_v53 = vpop.f32.mrf.mxu1  ;;  %v1090_v54 = vpop.f32.mrf.mxu0 }
  0xf4   :  { %v1091_v56 = vadd.f32 %v1090_v54, %v1089_v52 }
  0xf5   :  { %v1125_v58 = vpop.f32.mrf.mxu1 }
  0xf6   :  { %v357_v59 = vadd.f32 %v1091_v56, %v1044_v57  ;;  %v1126_v60 = vadd.f32 %v1125_v58, %v1124_v53 }
  0xf8   :  { %v427_v1 = vadd.f32 %v1126_v60, %v357_v59 }
 0x113   :  { %v1159_v61 = vpop.f32.mrf.mxu0 }
 0x114   :  { %v1194_v62 = vpop.f32.mrf.mxu1 }
 0x115   :  { %v1160_v63 = vpop.f32.mrf.mxu0 }
 0x116   :  { %v1195_v0 = vpop.f32.mrf.mxu1  ;;  %v1161_v2 = vadd.f32 %v1160_v63, %v1159_v61 }
 0x117   :  { %v1196_v4 = vadd.f32 %v1195_v0, %v1194_v62 }
 0x118   :  { %v497_v3 = vadd.f32 %v1161_v2, %v427_v1 }
 0x11a   :  { %v567_v5 = vadd.f32 %v1196_v4, %v497_v3 }
 0x11c   :  { %v570_v6 = vmax.f32 %v567_v5, 0.0 }
 0x11e   :  { %1265 = vmatmul.mubr.f32.vlgmr.msra.gmra.mxu0 %v570_v6 }
 0x1de   :  { %v660_v11 = vpop.f32.mrf.mxu0 }
 0x1df   :  { %v661_v12 = vadd.f32 %v1045_v10, %v660_v11 }
 0x1e0   :  { %v1266_v13 = vpop.f32.mrf.mxu0 }
 0x1e1   :  { %v664_v14 = vmax.f32 %v661_v12, 0.0 }
 0x1e3   :  { %1284 = vmatmul.mubr.msk.f32.vlgmr.msra.gmra.mxu1 %vm680_vm1, %v664_v14 }
 0x1e4   :  { %1290 = vmatprep.mubr.msk.f32.mxu1 %vm1381_vm0, %v1380_v31  ;;  %1287 = vmatpush3.msk.msra.mxu1 %vm768_vm2, %v756_v15 }
 0x1e5   :  { %1288 = vmatprep.subr.mxu1 %v1380_v31 }
 0x1e6   :  { %1289 = vmatpush3.msra.mxu1 %v755_v16 }
 0x1e7   :  { %1293 = vmatprep.subr.mxu1 %v1380_v31 }
 0x2a3   :  { %v750_v18 = vpop.f32.mrf.mxu1 }
 0x2a4   :  { %v751_v19 = vadd.f32 %v1046_v17, %v750_v18 }
 0x2a5   :  { %v1285_v20 = vpop.f32.mrf.mxu1 }
 0x2a6   :  { %v754_v21 = vmax.f32 %v751_v19, 0.0 }
 0x2a8   :  { %1291 = vmatmul.mubr.msk.f32.vlgmr.msra.gmra.mxu1 %vm764_vm3, %v754_v21 }
 0x2a9   :  { %1297 = vmatprep.mubr.msk.f32.mxu1 %vm1381_vm0, %v1380_v31  ;;  %1294 = vmatpush3.msk.msra.mxu1 %vm768_vm2, %v844_v22 }
 0x2aa   :  { %1295 = vmatprep.subr.mxu1 %v1380_v31 }
 0x2ab   :  { %1296 = vmatpush3.msra.mxu1 %v843_v23 }
 0x2ac   :  { %1300 = vmatprep.subr.mxu1 %v1380_v31 }
 0x368   :  { %v838_v25 = vpop.f32.mrf.mxu1 }
 0x369   :  { %v839_v26 = vadd.f32 %v1048_v24, %v838_v25 }
 0x36a   :  { %v1292_v27 = vpop.f32.mrf.mxu1 }
 0x36b   :  { %v842_v55 = vmax.f32 %v839_v26, 0.0 }
 0x36d   :  { %1298 = vmatmul.mubr.msk.f32.vlgmr.msra.gmra.mxu1 %vm764_vm3, %v842_v55 }
 0x36e   :  { %1304 = vmatprep.mubr.msk.f32.mxu1 %vm1381_vm0, %v1380_v31  ;;  %1301 = vmatpush3.msk.msra.mxu1 %vm768_vm2, %v930_v28 }
 0x36f   :  { %1302 = vmatprep.subr.mxu1 %v1380_v31 }
 0x370   :  { %1303 = vmatpush3.msra.mxu1 %v929_v29 }
 0x42d   :  { %v924_v32 = vpop.f32.mrf.mxu1 }
 0x42e   :  { %v925_v33 = vadd.f32 %v1051_v30, %v924_v32 }
 0x42f   :  { %v1299_v34 = vpop.f32.mrf.mxu1 }
 0x430   :  { %v928_v35 = vmax.f32 %v925_v33, 0.0 }
 0x432   :  { %1305 = vmatmul.mubr.msk.f32.vlgmr.msra.gmra.mxu1 %vm764_vm3, %v928_v35 }
 0x4f2   :  { %v1010_v31 = vpop.f32.mrf.mxu1 }
 0x4f3   :  { %v1011_v37 = vadd.f32 %v1054_v36, %v1010_v31 }
 0x4f4   :  { %v1306_v38 = vpop.f32.mrf.mxu1 }
 0x4f5   :  { %v1014_v39 = vsel %vm764_vm3, %v1011_v37, -inf }
 0x4f6   :  { %1015 = vmax.xlane.f32.xlu0 %v1014_v39 }
 0x57f   :  { %v1016_v40 = vpop.xlane.xlu0 %1015 }
 0x580   :  { %v1017_v41 = vsub.f32 %v1011_v37, %v1016_v40 }
 0x582   :  { %v1018_v42 = vmul.f32 1.442695, %v1017_v41 }
 0x584   :  { %1328 = vpow2.f32 %v1018_v42 }
 0x591   :  { %v1329_v43 = vpop.eup %1328 }
 0x592   :  { %v1020_v44 = vsel %vm764_vm3, %v1329_v43, 0.0 }
 0x593   :  { %1021 = vadd.xlane.f32.xlu0 %v1020_v44 }
 0x61c   :  { %v1022_v45 = vpop.xlane.xlu0 %1021 }
 0x61d   :  { %1330 = vlog2.f32 %v1022_v45 }
 0x62a   :  { %v1331_v46 = vpop.eup %1330 }
 0x62b   :  { %v1024_v47 = vmul.f32 0.6931472, %v1331_v46 }
 0x62d   :  { %v1025_v48 = vsub.f32 %v1017_v41, %v1024_v47 }
 0x62f   :  { %1026 = vst.msk [vmem:[#allocation5] sm:$0xff] %vm764_vm3, %v1025_v48 }
 0x630   :  { %1031 = vsyncadd [#allocation4], 96  ;;  %s1382_s10 = smov [#allocation5]  }
 0x631   :  { %s1032_s11 = sshll.u32 %s1382_s10, 4  ;;  %s1033_s11 = int_to_ptr.vmem [resolvable:$true] %s1032_s11 }
 0x632   :  { %s1352_s12 = scalar_lea.vmem %s1033_s11, 32  ;;  %s1356_s17 = scalar_lea.vmem %s1033_s11, 128 }
 0x633   :  { %p1353_p5 = scmp.ne.s32.totalorder %s1033_s11, %s1352_s12  ;;  %p1357_p6 = scmp.lt.s32.totalorder %s1033_s11, %s1033_s11 }
 0x634   :  { %p1358_p7 = scmp.lt.s32.totalorder %s1356_s17, %s1352_s12 }
 0x636   :  { %p1359_p8 = por %p1358_p7, %p1357_p6 }
 0x638   :  { %p1360_p9 = pnand %p1359_p8, %p1353_p5 }
 0x63a   :  { %1363 = shalt.err (!%p1360_p9)
}
 0x63b   :  { %s1383_s2 = smov 32   ;;  %s1384_s18 = smov 2  }
 0x63c   :  { %1038 = dma.vmem_to_hbm [thread:$0]  %s1033_s11, 32, %s1665_s13, [#allocation4], %s1383_s2, %s1383_s2, %s1384_s18  }
 0x63d   :  { %1374 = dma.done.wait [#allocation4], 128  }
 0x63e   :  { %1375 = vsyncadd [#allocation4], 4294967168 }
 0x63f   :  { %1042 = vsyncpa [#allocation3], 1 }
 0x640   :  { %1043 = vsyncpa [#allocation4], 1 }

</bundles_post_ra>
